<compile_context>
chip_gen: v6e
topology: v6e:2x2x1
jax: 0.10.0
libtpu: 0.0.40
codegen_flags: <defaults>
</compile_context>

<pallas_src>
import jax
import jax.numpy as jnp
from jax import lax
from jax.experimental import pallas as pl
from jax.experimental.pallas import tpu as pltpu

IN_FEATURES = 3 * 32 * 32     # 3072 = 24 * 128  (K already lane-aligned)
OUT_FEATURES = 100
OUT_PADDED = 128              # lane-dense N
MAX_TM = 512                  # batch tile (multiple of 8), v7x VMEM-safe


def linear_kernel(x_ref, w_ref, b_ref, o_ref):
    # x_ref: (TM, 3072)   VMEM batch tile
    # w_ref: (128, 3072)  VMEM resident padded weight (NOT transposed)
    # b_ref: (1, 128)     VMEM resident padded bias
    # o_ref: (TM, 128)    VMEM lane-dense output tile
    acc = lax.dot_general(
        x_ref[...], w_ref[...],
        dimension_numbers=(((1,), (1,)), ((), ())),   # contract K with K (trans_b)
        preferred_element_type=jnp.float32)
    o_ref[...] = (acc + b_ref[...]).astype(o_ref.dtype)


def prepare_params(weight, bias):
    """One-time padding: weight (100,3072)->(128,3072), bias (100,)->(1,128)."""
    w_pad = jnp.zeros((OUT_PADDED, IN_FEATURES), weight.dtype)
    w_pad = w_pad.at[:OUT_FEATURES, :].set(weight)
    b_pad = jnp.zeros((1, OUT_PADDED), bias.dtype)
    b_pad = b_pad.at[0, :OUT_FEATURES].set(bias)
    return w_pad, b_pad


def _choose_tm(b):
    # Full-batch single block when small (full-extent blocks are always
    # layout-legal); otherwise 8-aligned tiles, partial last tile is masked.
    return b if b <= MAX_TM else MAX_TM


@jax.jit
def mlp_forward(x, w_pad, b_pad):
    """x: (B, 3, 32, 32) f32; w_pad: (128, 3072); b_pad: (1, 128) -> (B, 100)."""
    b = x.shape[0]
    x_flat = x.reshape(b, IN_FEATURES)        # same as torch view(B, -1)
    tm = _choose_tm(b)
    grid = (pl.cdiv(b, tm),)

    cost = pl.CostEstimate(
        flops=2 * b * IN_FEATURES * OUT_PADDED,
        transcendentals=0,
        bytes_accessed=(b * IN_FEATURES * x_flat.dtype.itemsize
                        + OUT_PADDED * IN_FEATURES * w_pad.dtype.itemsize
                        + OUT_PADDED * b_pad.dtype.itemsize
                        + b * OUT_PADDED * 4))

    out_padded = pl.pallas_call(
        linear_kernel,
        out_shape=jax.ShapeDtypeStruct((b, OUT_PADDED), jnp.float32),
        grid_spec=pl.GridSpec(
            grid=grid,
            in_specs=[
                pl.BlockSpec((tm, IN_FEATURES), lambda i: (i, 0)),
                pl.BlockSpec((OUT_PADDED, IN_FEATURES), lambda i: (0, 0)),
                pl.BlockSpec((1, OUT_PADDED), lambda i: (0, 0)),
            ],
            out_specs=pl.BlockSpec((tm, OUT_PADDED), lambda i: (i, 0)),
        ),
        compiler_params=pltpu.CompilerParams(
            dimension_semantics=("parallel",),   # batch tiles across TCs (v7x)
        ),
        cost_estimate=cost,
    )(x_flat, w_pad, b_pad)

    # Drop the lane padding back to the module's 100 logits.
    return out_padded[:, :OUT_FEATURES]


def init_params(key):
    # Match torch.nn.Linear default init: U(-1/sqrt(fan_in), 1/sqrt(fan_in))
    kw, kb = jax.random.split(key)
    bound = 1.0 / (IN_FEATURES ** 0.5)
    weight = jax.random.uniform(
        kw, (OUT_FEATURES, IN_FEATURES), jnp.float32, -bound, bound)
    bias = jax.random.uniform(
        kb, (OUT_FEATURES,), jnp.float32, -bound, bound)
    return weight, bias


if __name__ == "__main__":
    key = jax.random.PRNGKey(0)
    k_x, k_p = jax.random.split(key)

    batch = 2
    x = jax.random.normal(k_x, (batch, 3, 32, 32), jnp.float32)
    weight, bias = init_params(k_p)

    # Hoisted once (not per forward call): pad to lane-dense shapes.
    w_pad, b_pad = prepare_params(weight, bias)

    out = mlp_forward(x, w_pad, b_pad)
    out = jax.block_until_ready(out)

    # Sanity check against plain-JAX reference (original f32 semantics).
    ref = x.reshape(batch, -1) @ weight.T + bias
    assert out.shape == (batch, OUT_FEATURES)
    assert jnp.allclose(out, ref, atol=1e-3, rtol=1e-3)

    print("KERNEL_OK")
</pallas_src>

<mosaic_0001>
module attributes {stable_mosaic.version = 11 : i64} {
  func.func @linear_kernel(%arg0: i32, %arg1: memref<2x3072xf32, #tpu.memory_space<vmem>>, %arg2: memref<128x3072xf32, #tpu.memory_space<vmem>>, %arg3: memref<1x128xf32, #tpu.memory_space<vmem>>, %arg4: memref<2x128xf32, #tpu.memory_space<vmem>>) attributes {dimension_semantics = [#tpu.dimension_semantics<parallel>], iteration_bounds = array<i64: 1>, scalar_prefetch = 0 : i64, scratch_operands = 0 : i64, tpu.core_type = #tpu.core_type<tc>, window_params = [{transform_indices = @transform_0, window_bounds = array<i64: 2, 3072>}, {pipeline_mode = #tpu.pipeline_mode<synchronous>, transform_indices = @transform_1, window_bounds = array<i64: 128, 3072>}, {pipeline_mode = #tpu.pipeline_mode<synchronous>, transform_indices = @transform_2, window_bounds = array<i64: 1, 128>}, {transform_indices = @transform_3, window_bounds = array<i64: 2, 128>}]} {
    %c0 = arith.constant 0 : index
    %c0_0 = arith.constant 0 : index
    %0 = vector.load %arg1[%c0, %c0_0] : memref<2x3072xf32, #tpu.memory_space<vmem>>, vector<2x3072xf32>
    %c0_1 = arith.constant 0 : index
    %c0_2 = arith.constant 0 : index
    %1 = vector.load %arg2[%c0_1, %c0_2] : memref<128x3072xf32, #tpu.memory_space<vmem>>, vector<128x3072xf32>
    %cst = arith.constant dense<0.000000e+00> : vector<2x128xf32>
    %2 = tpu.matmul %0, %1, %cst {dimension_numbers = #tpu.dot_dimension_numbers<[1], [1], [0], [0], [0, 0, 1, 0], [], []>} : vector<2x3072xf32>, vector<128x3072xf32>, vector<2x128xf32> -> vector<2x128xf32>
    %c0_3 = arith.constant 0 : index
    %c0_4 = arith.constant 0 : index
    %3 = vector.load %arg3[%c0_3, %c0_4] : memref<1x128xf32, #tpu.memory_space<vmem>>, vector<1x128xf32>
    %4 = vector.broadcast %3 : vector<1x128xf32> to vector<2x128xf32>
    %5 = arith.addf %2, %4 : vector<2x128xf32>
    %c0_5 = arith.constant 0 : index
    %c0_6 = arith.constant 0 : index
    %6 = vector.load %arg4[%c0_5, %c0_6] : memref<2x128xf32, #tpu.memory_space<vmem>>, vector<2x128xf32>
    tpu.vector_store %arg4[%c0_5, %c0_6], %5 {strides = array<i32>} : memref<2x128xf32, #tpu.memory_space<vmem>>, vector<2x128xf32>,
    return
  }
  func.func @transform_0(%arg0: i32) -> (i32, i32) {
    %c0_i32 = arith.constant 0 : i32
    %c0_i32_0 = arith.constant 0 : i32
    return %arg0, %c0_i32 : i32, i32
  }
  func.func @transform_1(%arg0: i32) -> (i32, i32) {
    %c0_i32 = arith.constant 0 : i32
    %c0_i32_0 = arith.constant 0 : i32
    %c0_i32_1 = arith.constant 0 : i32
    return %c0_i32, %c0_i32_0 : i32, i32
  }
  func.func @transform_2(%arg0: i32) -> (i32, i32) {
    %c0_i32 = arith.constant 0 : i32
    %c0_i32_0 = arith.constant 0 : i32
    %c0_i32_1 = arith.constant 0 : i32
    return %c0_i32, %c0_i32_0 : i32, i32
  }
  func.func @transform_3(%arg0: i32) -> (i32, i32) {
    %c0_i32 = arith.constant 0 : i32
    %c0_i32_0 = arith.constant 0 : i32
    return %arg0, %c0_i32 : i32, i32
  }
}

</mosaic_0001>

<bundles_post_ra>
// kernel: mlp_forward.1
= control target key start
LH: loop header
LB: loop body
LE: loop exit
PB: predicated region body
PF: predicated region fallthrough
CT: control target
= control target key end

     0   :  { %8 = vsyncpa [#allocation3], 0  ;;  %s1639_s0 = inlined_call_operand.vmem [shape: f32[2,3072], index: 0, kind: input, shape index: {}]   ;;  %s1640_s1 = inlined_call_operand.hbm [shape: f32[128,3072], index: 1, kind: input, shape index: {}]   ;;  %s1641_s2 = inlined_call_operand.hbm [shape: f32[1,128], index: 2, kind: input, shape index: {}]   ;;  %s1642_s3 = inlined_call_operand.hbm [shape: f32[2,128], index: 3, kind: output, shape index: {}]  }
   0x1   :  { %9 = vsyncpa [#allocation6], 0 }
   0x2   :  { %10 = vsyncpa [#allocation4], 0  ;;  %s1506_s12 = smov [#allocation2]  }
   0x3   :  { %s18_s13 = sshll.u32 %s1506_s12, 4  ;;  %s19_s13 = int_to_ptr.vmem [resolvable:$true] %s18_s13 }
   0x4   :  { %s1448_s14 = scalar_lea.vmem %s19_s13, 49152  ;;  %p1453_p1 = scmp.lt.s32.totalorder %s19_s13, %s19_s13 }
   0x5   :  { %p1449_p0 = scmp.ne.s32.totalorder %s19_s13, %s1448_s14  ;;  %p1454_p2 = scmp.lt.s32.totalorder %s1448_s14, %s1448_s14 }
   0x7   :  { %p1455_p3 = por %p1454_p2, %p1453_p1 }
   0x9   :  { %p1456_p4 = pnand %p1455_p3, %p1449_p0 }
   0xb   :  { %1459 = shalt.err (!%p1456_p4)
}
   0xc   :  { %s1507_s15 = smov 3072   ;;  %s1508_s16 = smov 192  }
   0xd   :  { %24 = dma.hbm_to_vmem [thread:$0]  %s1640_s1, 49152, %s19_s13, [#allocation3], %s1507_s15, %s1507_s15, %s1508_s16  }
   0xe   :  { %s1509_s19 = smov [#allocation5]  }
   0xf   :  { %s31_s20 = sshll.u32 %s1509_s19, 4  ;;  %s32_s20 = int_to_ptr.vmem [resolvable:$true] %s31_s20 }
  0x10   :  { %s1468_s21 = scalar_lea.vmem %s32_s20, 16  ;;  %s1472_s22 = scalar_lea.vmem %s32_s20, 32 }
  0x11   :  { %p1469_p5 = scmp.ne.s32.totalorder %s32_s20, %s1468_s21  ;;  %p1473_p6 = scmp.lt.s32.totalorder %s32_s20, %s32_s20 }
  0x12   :  { %p1474_p7 = scmp.lt.s32.totalorder %s1472_s22, %s1468_s21 }
  0x14   :  { %p1475_p8 = por %p1474_p7, %p1473_p6 }
  0x16   :  { %p1476_p9 = pnand %p1475_p8, %p1469_p5 }
  0x18   :  { %1479 = shalt.err (!%p1476_p9)
}
  0x19   :  { %34 = dma.hbm_to_vmem [thread:$0]  %s1641_s2, 16, %s32_s20, [#allocation6]  }
  0x1a   :  { %1500 = dma.done.wait [#allocation3], 49152  }
  0x1b   :  { %1501 = vsyncadd [#allocation3], 4294918144 }
  0x1c   :  { %1502 = dma.done.wait [#allocation6], 16  }
  0x1d   :  { %1503 = vsyncadd [#allocation6], 4294967280  ;;  %v408_v0 = vld [vmem:[#allocation2 + $0xb48] sm:$0xff]  ;;  %v410_v1 = vld [vmem:[#allocation2 + $0xb58] sm:$0xff]  ;;  %v1510_v14 = vmov 1983009808   ;;  %v448_v16 = vlaneseq }
  0x1e   :  { %v407_v2 = vld [vmem:[#allocation2 + $0xb40] sm:$0xff]  ;;  %570 = vmatprep.subr.mxu0 %v408_v0  ;;  %640 = vmatprep.subr.mxu1 %v410_v1  ;;  %v409_v3 = vld [vmem:[#allocation2 + $0xb50] sm:$0xff]  ;;  %v384_v4 = vld [vmem:[#allocation2 + $0xa88] sm:$0xff]  ;;  %v446_v15 = vunpack.c.l.s4 %v1510_v14 }
  0x1f   :  { %v386_v5 = vld [vmem:[#allocation2 + $0xa98] sm:$0xff]  ;;  %571 = vmatpush1.xpose.msra.mxu0 %v407_v2  ;;  %641 = vmatpush1.xpose.msra.mxu1 %v409_v3  ;;  %v383_v6 = vld [vmem:[#allocation2 + $0xa80] sm:$0xff]  ;;  %v385_v7 = vld [vmem:[#allocation2 + $0xa90] sm:$0xff]  ;;  %v449_v22 = vshrl.u32 %v448_v16, 7 }
  0x20   :  { %572 = vmatprep.subr.mxu0 %v384_v4  ;;  %642 = vmatprep.subr.mxu1 %v386_v5  ;;  %v360_v8 = vld [vmem:[#allocation2 + $0x9c8] sm:$0xff]  ;;  %v362_v9 = vld [vmem:[#allocation2 + $0x9d8] sm:$0xff]  ;;  %v359_v10 = vld [vmem:[#allocation2 + $0x9c0] sm:$0xff]  ;;  %v447_v21 = vunpack.c.0.s8 %v446_v15 }
  0x21   :  { %v361_v11 = vld [vmem:[#allocation2 + $0x9d0] sm:$0xff]  ;;  %v336_v12 = vld [vmem:[#allocation2 + $0x908] sm:$0xff]  ;;  %v338_v13 = vld [vmem:[#allocation2 + $0x918] sm:$0xff] }
  0x22   :  { %v335_v17 = vld [vmem:[#allocation2 + $0x900] sm:$0xff]  ;;  %v337_v18 = vld [vmem:[#allocation2 + $0x910] sm:$0xff]  ;;  %v312_v19 = vld [vmem:[#allocation2 + $0x848] sm:$0xff]  ;;  %v1538_v27 = vsub.s32 %v447_v21, %v449_v22 }
  0x23   :  { %573 = vmatpush1.xpose.msra.mxu0 %v383_v6  ;;  %643 = vmatpush1.xpose.msra.mxu1 %v385_v7  ;;  %v314_v20 = vld [vmem:[#allocation2 + $0x858] sm:$0xff]  ;;  %v311_v23 = vld [vmem:[#allocation2 + $0x840] sm:$0xff]  ;;  %v313_v24 = vld [vmem:[#allocation2 + $0x850] sm:$0xff] }
  0x24   :  { %574 = vmatprep.subr.mxu0 %v360_v8  ;;  %644 = vmatprep.subr.mxu1 %v362_v9  ;;  %v288_v25 = vld [vmem:[#allocation2 + $0x788] sm:$0xff]  ;;  %v290_v26 = vld [vmem:[#allocation2 + $0x798] sm:$0xff]  ;;  %v287_v28 = vld [vmem:[#allocation2 + $0x780] sm:$0xff] }
  0x25   :  { %v289_v29 = vld [vmem:[#allocation2 + $0x790] sm:$0xff]  ;;  %v264_v30 = vld [vmem:[#allocation2 + $0x6c8] sm:$0xff]  ;;  %v266_v31 = vld [vmem:[#allocation2 + $0x6d8] sm:$0xff] }
  0x26   :  { %v41_v32 = vld [vmem:[%s1639_s0] sm:$0xff]  ;;  %v265_v36 = vld [vmem:[#allocation2 + $0x6d0] sm:$0xff]  ;;  %v240_v37 = vld [vmem:[#allocation2 + $0x608] sm:$0xff] }
  0x27   :  { %575 = vmatpush1.xpose.msra.mxu0 %v359_v10  ;;  %645 = vmatpush1.xpose.msra.mxu1 %v361_v11  ;;  %v1544_v33 = vrot.slane %v41_v32, %v1538_v27  ;;  %v444_v34 = vcombine.high %v41_v32, %v41_v32  ;;  %v263_v35 = vld [vmem:[#allocation2 + $0x6c0] sm:$0xff]  ;;  %v242_v38 = vld [vmem:[#allocation2 + $0x618] sm:$0xff]  ;;  %v241_v43 = vld [vmem:[#allocation2 + $0x610] sm:$0xff] }
  0x28   :  { %576 = vmatprep.subr.mxu0 %v336_v12  ;;  %646 = vmatprep.subr.mxu1 %v338_v13  ;;  %v239_v42 = vld [vmem:[#allocation2 + $0x600] sm:$0xff]  ;;  %v216_v44 = vld [vmem:[#allocation2 + $0x548] sm:$0xff]  ;;  %v218_v45 = vld [vmem:[#allocation2 + $0x558] sm:$0xff] }
  0x29   :  { %v459_v39 = vcombine.high %v1544_v33, %v1544_v33  ;;  %v1549_v40 = vrot.slane %v444_v34, %v1538_v27  ;;  %v215_v46 = vld [vmem:[#allocation2 + $0x540] sm:$0xff]  ;;  %v217_v47 = vld [vmem:[#allocation2 + $0x550] sm:$0xff]  ;;  %v192_v48 = vld [vmem:[#allocation2 + $0x488] sm:$0xff] }
  0x2a   :  { %v194_v49 = vld [vmem:[#allocation2 + $0x498] sm:$0xff]  ;;  %v191_v50 = vld [vmem:[#allocation2 + $0x480] sm:$0xff]  ;;  %v193_v51 = vld [vmem:[#allocation2 + $0x490] sm:$0xff] }
  0x2b   :  { %577 = vmatpush1.xpose.msra.mxu0 %v335_v17  ;;  %647 = vmatpush1.xpose.msra.mxu1 %v337_v18  ;;  %v460_v41 = vcombine.high %v1549_v40, %v1549_v40  ;;  %v168_v52 = vld [vmem:[#allocation2 + $0x3c8] sm:$0xff]  ;;  %v170_v53 = vld [vmem:[#allocation2 + $0x3d8] sm:$0xff]  ;;  %v167_v54 = vld [vmem:[#allocation2 + $0x3c0] sm:$0xff] }
  0x2c   :  { %578 = vmatprep.subr.mxu0 %v312_v19  ;;  %648 = vmatprep.subr.mxu1 %v314_v20  ;;  %v169_v55 = vld [vmem:[#allocation2 + $0x3d0] sm:$0xff]  ;;  %v144_v56 = vld [vmem:[#allocation2 + $0x308] sm:$0xff]  ;;  %v146_v57 = vld [vmem:[#allocation2 + $0x318] sm:$0xff] }
  0x2d   :  { %634 = vmatprep.mubr.f32.mxu0 %v459_v39  ;;  %704 = vmatprep.mubr.f32.mxu1 %v460_v41  ;;  %v143_v58 = vld [vmem:[#allocation2 + $0x300] sm:$0xff]  ;;  %v145_v59 = vld [vmem:[#allocation2 + $0x310] sm:$0xff]  ;;  %v120_v60 = vld [vmem:[#allocation2 + $0x248] sm:$0xff] }
  0x2e   :  { %v122_v61 = vld [vmem:[#allocation2 + $0x258] sm:$0xff]  ;;  %v119_v62 = vld [vmem:[#allocation2 + $0x240] sm:$0xff]  ;;  %v121_v63 = vld [vmem:[#allocation2 + $0x250] sm:$0xff] }
  0x2f   :  { %579 = vmatpush1.xpose.msra.mxu0 %v311_v23  ;;  %649 = vmatpush1.xpose.msra.mxu1 %v313_v24  ;;  %v96_v0 = vld [vmem:[#allocation2 + $0x188] sm:$0xff]  ;;  %v98_v1 = vld [vmem:[#allocation2 + $0x198] sm:$0xff]  ;;  %v95_v2 = vld [vmem:[#allocation2 + $0x180] sm:$0xff] }
  0x30   :  { %580 = vmatprep.subr.mxu0 %v288_v25  ;;  %650 = vmatprep.subr.mxu1 %v290_v26  ;;  %v97_v3 = vld [vmem:[#allocation2 + $0x190] sm:$0xff]  ;;  %v72_v4 = vld [vmem:[#allocation2 + $0xc8] sm:$0xff]  ;;  %v74_v5 = vld [vmem:[#allocation2 + $0xd8] sm:$0xff] }
  0x31   :  { %v42_v6 = vld [vmem:[%s1639_s0 + $0x8] sm:$0xff]  ;;  %v71_v7 = vld [vmem:[#allocation2 + $0xc0] sm:$0xff]  ;;  %v73_v8 = vld [vmem:[#allocation2 + $0xd0] sm:$0xff] }
  0x32   :  { %v48_v9 = vld [vmem:[#allocation2 + $0x8] sm:$0xff]  ;;  %v50_v10 = vld [vmem:[#allocation2 + $0x18] sm:$0xff]  ;;  %v461_v11 = vcombine.high %v42_v6, %v42_v6  ;;  %v47_v12 = vld [vmem:[#allocation2] sm:$0xff]  ;;  %v1557_v16 = vrot.slane %v42_v6, %v1538_v27 }
  0x33   :  { %581 = vmatpush1.xpose.msra.mxu0 %v287_v28  ;;  %651 = vmatpush1.xpose.msra.mxu1 %v289_v29  ;;  %v49_v13 = vld [vmem:[#allocation2 + $0x10] sm:$0xff]  ;;  %v412_v14 = vld [vmem:[#allocation2 + $0xb68] sm:$0xff]  ;;  %v414_v15 = vld [vmem:[#allocation2 + $0xb78] sm:$0xff] }
  0x34   :  { %582 = vmatprep.subr.mxu0 %v264_v30  ;;  %652 = vmatprep.subr.mxu1 %v266_v31  ;;  %v1560_v17 = vrot.slane %v461_v11, %v1538_v27  ;;  %v411_v18 = vld [vmem:[#allocation2 + $0xb60] sm:$0xff]  ;;  %v413_v19 = vld [vmem:[#allocation2 + $0xb70] sm:$0xff]  ;;  %v388_v20 = vld [vmem:[#allocation2 + $0xaa8] sm:$0xff]  ;;  %v476_v22 = vcombine.high %v1557_v16, %v1557_v16 }
  0x35   :  { %v390_v21 = vld [vmem:[#allocation2 + $0xab8] sm:$0xff]  ;;  %v387_v24 = vld [vmem:[#allocation2 + $0xaa0] sm:$0xff]  ;;  %v389_v25 = vld [vmem:[#allocation2 + $0xab0] sm:$0xff] }
  0x36   :  { %v477_v23 = vcombine.high %v1560_v17, %v1560_v17  ;;  %v364_v26 = vld [vmem:[#allocation2 + $0x9e8] sm:$0xff]  ;;  %v366_v28 = vld [vmem:[#allocation2 + $0x9f8] sm:$0xff]  ;;  %v363_v29 = vld [vmem:[#allocation2 + $0x9e0] sm:$0xff] }
  0x37   :  { %583 = vmatpush1.xpose.msra.mxu0 %v263_v35  ;;  %653 = vmatpush1.xpose.msra.mxu1 %v265_v36  ;;  %v365_v30 = vld [vmem:[#allocation2 + $0x9f0] sm:$0xff]  ;;  %v340_v31 = vld [vmem:[#allocation2 + $0x928] sm:$0xff]  ;;  %v342_v32 = vld [vmem:[#allocation2 + $0x938] sm:$0xff] }
  0x38   :  { %584 = vmatprep.subr.mxu0 %v240_v37  ;;  %654 = vmatprep.subr.mxu1 %v242_v38  ;;  %v341_v34 = vld [vmem:[#allocation2 + $0x930] sm:$0xff]  ;;  %v316_v35 = vld [vmem:[#allocation2 + $0x868] sm:$0xff]  ;;  %v318_v36 = vld [vmem:[#allocation2 + $0x878] sm:$0xff] }
  0x39   :  { %v315_v37 = vld [vmem:[#allocation2 + $0x860] sm:$0xff]  ;;  %v317_v38 = vld [vmem:[#allocation2 + $0x870] sm:$0xff]  ;;  %v292_v39 = vld [vmem:[#allocation2 + $0x7a8] sm:$0xff] }
  0x3a   :  { %v291_v41 = vld [vmem:[#allocation2 + $0x7a0] sm:$0xff]  ;;  %v125_v6 = vld [vmem:[#allocation2 + $0x270] sm:$0xff]  ;;  %v76_v11 = vld [vmem:[#allocation2 + $0xe8] sm:$0xff] }
  0x3b   :  { %585 = vmatpush1.xpose.msra.mxu0 %v239_v42  ;;  %655 = vmatpush1.xpose.msra.mxu1 %v241_v43  ;;  %v293_v42 = vld [vmem:[#allocation2 + $0x7b0] sm:$0xff]  ;;  %v268_v43 = vld [vmem:[#allocation2 + $0x6e8] sm:$0xff] }
  0x3c   :  { %586 = vmatprep.subr.mxu0 %v216_v44  ;;  %656 = vmatprep.subr.mxu1 %v218_v45  ;;  %v270_v44 = vld [vmem:[#allocation2 + $0x6f8] sm:$0xff]  ;;  %v267_v45 = vld [vmem:[#allocation2 + $0x6e0] sm:$0xff] }
  0x3f   :  { %587 = vmatpush1.xpose.msra.mxu0 %v215_v46  ;;  %657 = vmatpush1.xpose.msra.mxu1 %v217_v47  ;;  %v269_v46 = vld [vmem:[#allocation2 + $0x6f0] sm:$0xff]  ;;  %v244_v47 = vld [vmem:[#allocation2 + $0x628] sm:$0xff] }
  0x40   :  { %588 = vmatprep.subr.mxu0 %v192_v48  ;;  %658 = vmatprep.subr.mxu1 %v194_v49  ;;  %v246_v48 = vld [vmem:[#allocation2 + $0x638] sm:$0xff]  ;;  %v243_v49 = vld [vmem:[#allocation2 + $0x620] sm:$0xff] }
  0x43   :  { %589 = vmatpush1.xpose.msra.mxu0 %v191_v50  ;;  %659 = vmatpush1.xpose.msra.mxu1 %v193_v51  ;;  %v245_v50 = vld [vmem:[#allocation2 + $0x630] sm:$0xff]  ;;  %v220_v51 = vld [vmem:[#allocation2 + $0x568] sm:$0xff] }
  0x44   :  { %590 = vmatprep.subr.mxu0 %v168_v52  ;;  %660 = vmatprep.subr.mxu1 %v170_v53  ;;  %v222_v52 = vld [vmem:[#allocation2 + $0x578] sm:$0xff]  ;;  %v219_v53 = vld [vmem:[#allocation2 + $0x560] sm:$0xff] }
  0x47   :  { %591 = vmatpush1.xpose.msra.mxu0 %v167_v54  ;;  %661 = vmatpush1.xpose.msra.mxu1 %v169_v55  ;;  %v221_v54 = vld [vmem:[#allocation2 + $0x570] sm:$0xff]  ;;  %v196_v55 = vld [vmem:[#allocation2 + $0x4a8] sm:$0xff] }
  0x48   :  { %592 = vmatprep.subr.mxu0 %v144_v56  ;;  %662 = vmatprep.subr.mxu1 %v146_v57  ;;  %v198_v56 = vld [vmem:[#allocation2 + $0x4b8] sm:$0xff]  ;;  %v195_v57 = vld [vmem:[#allocation2 + $0x4a0] sm:$0xff] }
  0x4b   :  { %593 = vmatpush1.xpose.msra.mxu0 %v143_v58  ;;  %663 = vmatpush1.xpose.msra.mxu1 %v145_v59  ;;  %v197_v58 = vld [vmem:[#allocation2 + $0x4b0] sm:$0xff]  ;;  %v172_v59 = vld [vmem:[#allocation2 + $0x3e8] sm:$0xff] }
  0x4c   :  { %594 = vmatprep.subr.mxu0 %v120_v60  ;;  %664 = vmatprep.subr.mxu1 %v122_v61  ;;  %v174_v60 = vld [vmem:[#allocation2 + $0x3f8] sm:$0xff]  ;;  %v171_v61 = vld [vmem:[#allocation2 + $0x3e0] sm:$0xff] }
  0x4f   :  { %595 = vmatpush1.xpose.msra.mxu0 %v119_v62  ;;  %665 = vmatpush1.xpose.msra.mxu1 %v121_v63  ;;  %v173_v62 = vld [vmem:[#allocation2 + $0x3f0] sm:$0xff]  ;;  %v148_v63 = vld [vmem:[#allocation2 + $0x328] sm:$0xff] }
  0x50   :  { %596 = vmatprep.subr.mxu0 %v96_v0  ;;  %666 = vmatprep.subr.mxu1 %v98_v1  ;;  %v150_v0 = vld [vmem:[#allocation2 + $0x338] sm:$0xff]  ;;  %v147_v1 = vld [vmem:[#allocation2 + $0x320] sm:$0xff] }
  0x53   :  { %597 = vmatpush1.xpose.msra.mxu0 %v95_v2  ;;  %667 = vmatpush1.xpose.msra.mxu1 %v97_v3  ;;  %v149_v2 = vld [vmem:[#allocation2 + $0x330] sm:$0xff]  ;;  %v124_v3 = vld [vmem:[#allocation2 + $0x268] sm:$0xff] }
  0x54   :  { %598 = vmatprep.subr.mxu0 %v72_v4  ;;  %668 = vmatprep.subr.mxu1 %v74_v5  ;;  %v126_v4 = vld [vmem:[#allocation2 + $0x278] sm:$0xff]  ;;  %v123_v5 = vld [vmem:[#allocation2 + $0x260] sm:$0xff] }
  0x57   :  { %599 = vmatpush1.xpose.msra.mxu0 %v71_v7  ;;  %669 = vmatpush1.xpose.msra.mxu1 %v73_v8  ;;  %v100_v7 = vld [vmem:[#allocation2 + $0x1a8] sm:$0xff]  ;;  %v102_v8 = vld [vmem:[#allocation2 + $0x1b8] sm:$0xff] }
  0x58   :  { %600 = vmatprep.subr.mxu0 %v48_v9  ;;  %670 = vmatprep.subr.mxu1 %v50_v10  ;;  %v99_v9 = vld [vmem:[#allocation2 + $0x1a0] sm:$0xff]  ;;  %v101_v10 = vld [vmem:[#allocation2 + $0x1b0] sm:$0xff] }
  0x5b   :  { %601 = vmatpush1.xpose.msra.mxu0 %v47_v12  ;;  %671 = vmatpush1.xpose.msra.mxu1 %v49_v13  ;;  %v78_v12 = vld [vmem:[#allocation2 + $0xf8] sm:$0xff]  ;;  %v43_v13 = vld [vmem:[%s1639_s0 + $0x10] sm:$0xff] }
  0x5c   :  { %710 = vmatprep.subr.mxu0 %v412_v14  ;;  %780 = vmatprep.subr.mxu1 %v414_v15  ;;  %v75_v14 = vld [vmem:[#allocation2 + $0xe0] sm:$0xff]  ;;  %v77_v15 = vld [vmem:[#allocation2 + $0xf0] sm:$0xff] }
  0x5e   :  { %635 = vmatmul.mubr.f32.vlgmr.msra.gmra.mxu0 %v1544_v33  ;;  %705 = vmatmul.mubr.f32.vlgmr.msra.gmra.mxu1 %v1549_v40  ;;  %v339_v33 = vld [vmem:[#allocation2 + $0x920] sm:$0xff]  ;;  %v294_v40 = vld [vmem:[#allocation2 + $0x7b8] sm:$0xff] }
  0x5f   :  { %711 = vmatpush1.xpose.msra.mxu0 %v411_v18  ;;  %781 = vmatpush1.xpose.msra.mxu1 %v413_v19  ;;  %v52_v18 = vld [vmem:[#allocation2 + $0x28] sm:$0xff]  ;;  %v54_v19 = vld [vmem:[#allocation2 + $0x38] sm:$0xff] }
  0x60   :  { %712 = vmatprep.subr.mxu0 %v388_v20  ;;  %782 = vmatprep.subr.mxu1 %v390_v21  ;;  %v478_v20 = vcombine.high %v43_v13, %v43_v13  ;;  %v51_v21 = vld [vmem:[#allocation2 + $0x20] sm:$0xff] }
  0x61   :  { %774 = vmatprep.mubr.f32.mxu0 %v476_v22  ;;  %844 = vmatprep.mubr.f32.mxu1 %v477_v23  ;;  %v53_v22 = vld [vmem:[#allocation2 + $0x30] sm:$0xff]  ;;  %v416_v23 = vld [vmem:[#allocation2 + $0xb88] sm:$0xff] }
  0x63   :  { %713 = vmatpush1.xpose.msra.mxu0 %v387_v24  ;;  %783 = vmatpush1.xpose.msra.mxu1 %v389_v25  ;;  %v418_v24 = vld [vmem:[#allocation2 + $0xb98] sm:$0xff]  ;;  %v1572_v25 = vrot.slane %v43_v13, %v1538_v27  ;;  %v129_v13 = vld [vmem:[#allocation2 + $0x290] sm:$0xff] }
  0x64   :  { %714 = vmatprep.subr.mxu0 %v364_v26  ;;  %784 = vmatprep.subr.mxu1 %v366_v28  ;;  %v1575_v26 = vrot.slane %v478_v20, %v1538_v27  ;;  %v415_v28 = vld [vmem:[#allocation2 + $0xb80] sm:$0xff]  ;;  %v80_v20 = vld [vmem:[#allocation2 + $0x108] sm:$0xff] }
  0x67   :  { %715 = vmatpush1.xpose.msra.mxu0 %v363_v29  ;;  %785 = vmatpush1.xpose.msra.mxu1 %v365_v30  ;;  %v417_v29 = vld [vmem:[#allocation2 + $0xb90] sm:$0xff]  ;;  %v392_v30 = vld [vmem:[#allocation2 + $0xac8] sm:$0xff] }
  0x68   :  { %716 = vmatprep.subr.mxu0 %v340_v31  ;;  %786 = vmatprep.subr.mxu1 %v342_v32  ;;  %v394_v31 = vld [vmem:[#allocation2 + $0xad8] sm:$0xff]  ;;  %v493_v32 = vcombine.high %v1572_v25, %v1572_v25 }
  0x6b   :  { %717 = vmatpush1.xpose.msra.mxu0 %v339_v33  ;;  %787 = vmatpush1.xpose.msra.mxu1 %v341_v34  ;;  %v494_v33 = vcombine.high %v1575_v26, %v1575_v26  ;;  %v391_v34 = vld [vmem:[#allocation2 + $0xac0] sm:$0xff] }
  0x6c   :  { %718 = vmatprep.subr.mxu0 %v316_v35  ;;  %788 = vmatprep.subr.mxu1 %v318_v36  ;;  %v393_v35 = vld [vmem:[#allocation2 + $0xad0] sm:$0xff]  ;;  %v368_v36 = vld [vmem:[#allocation2 + $0xa08] sm:$0xff] }
  0x6f   :  { %719 = vmatpush1.xpose.msra.mxu0 %v315_v37  ;;  %789 = vmatpush1.xpose.msra.mxu1 %v317_v38  ;;  %v370_v37 = vld [vmem:[#allocation2 + $0xa18] sm:$0xff]  ;;  %v367_v38 = vld [vmem:[#allocation2 + $0xa00] sm:$0xff] }
  0x70   :  { %720 = vmatprep.subr.mxu0 %v292_v39  ;;  %790 = vmatprep.subr.mxu1 %v294_v40  ;;  %v369_v39 = vld [vmem:[#allocation2 + $0xa10] sm:$0xff]  ;;  %v344_v40 = vld [vmem:[#allocation2 + $0x948] sm:$0xff] }
  0x73   :  { %721 = vmatpush1.xpose.msra.mxu0 %v291_v41  ;;  %791 = vmatpush1.xpose.msra.mxu1 %v293_v42  ;;  %v345_v41 = vld [vmem:[#allocation2 + $0x950] sm:$0xff]  ;;  %v320_v42 = vld [vmem:[#allocation2 + $0x888] sm:$0xff] }
  0x74   :  { %722 = vmatprep.subr.mxu0 %v268_v43  ;;  %792 = vmatprep.subr.mxu1 %v270_v44  ;;  %v322_v43 = vld [vmem:[#allocation2 + $0x898] sm:$0xff]  ;;  %v319_v44 = vld [vmem:[#allocation2 + $0x880] sm:$0xff] }
  0x77   :  { %723 = vmatpush1.xpose.msra.mxu0 %v267_v45  ;;  %793 = vmatpush1.xpose.msra.mxu1 %v269_v46  ;;  %v321_v45 = vld [vmem:[#allocation2 + $0x890] sm:$0xff]  ;;  %v296_v46 = vld [vmem:[#allocation2 + $0x7c8] sm:$0xff] }
  0x78   :  { %724 = vmatprep.subr.mxu0 %v244_v47  ;;  %794 = vmatprep.subr.mxu1 %v246_v48  ;;  %v298_v47 = vld [vmem:[#allocation2 + $0x7d8] sm:$0xff]  ;;  %v295_v48 = vld [vmem:[#allocation2 + $0x7c0] sm:$0xff] }
  0x7b   :  { %725 = vmatpush1.xpose.msra.mxu0 %v243_v49  ;;  %795 = vmatpush1.xpose.msra.mxu1 %v245_v50  ;;  %v297_v49 = vld [vmem:[#allocation2 + $0x7d0] sm:$0xff]  ;;  %v272_v50 = vld [vmem:[#allocation2 + $0x708] sm:$0xff] }
  0x7c   :  { %726 = vmatprep.subr.mxu0 %v220_v51  ;;  %796 = vmatprep.subr.mxu1 %v222_v52  ;;  %v274_v51 = vld [vmem:[#allocation2 + $0x718] sm:$0xff]  ;;  %v271_v52 = vld [vmem:[#allocation2 + $0x700] sm:$0xff] }
  0x7f   :  { %727 = vmatpush1.xpose.msra.mxu0 %v219_v53  ;;  %797 = vmatpush1.xpose.msra.mxu1 %v221_v54  ;;  %v273_v53 = vld [vmem:[#allocation2 + $0x710] sm:$0xff]  ;;  %v248_v54 = vld [vmem:[#allocation2 + $0x648] sm:$0xff] }
  0x80   :  { %728 = vmatprep.subr.mxu0 %v196_v55  ;;  %798 = vmatprep.subr.mxu1 %v198_v56  ;;  %v250_v55 = vld [vmem:[#allocation2 + $0x658] sm:$0xff]  ;;  %v247_v56 = vld [vmem:[#allocation2 + $0x640] sm:$0xff] }
  0x83   :  { %729 = vmatpush1.xpose.msra.mxu0 %v195_v57  ;;  %799 = vmatpush1.xpose.msra.mxu1 %v197_v58  ;;  %v249_v57 = vld [vmem:[#allocation2 + $0x650] sm:$0xff]  ;;  %v224_v58 = vld [vmem:[#allocation2 + $0x588] sm:$0xff] }
  0x84   :  { %730 = vmatprep.subr.mxu0 %v172_v59  ;;  %800 = vmatprep.subr.mxu1 %v174_v60  ;;  %v226_v59 = vld [vmem:[#allocation2 + $0x598] sm:$0xff]  ;;  %v223_v60 = vld [vmem:[#allocation2 + $0x580] sm:$0xff] }
  0x87   :  { %731 = vmatpush1.xpose.msra.mxu0 %v171_v61  ;;  %801 = vmatpush1.xpose.msra.mxu1 %v173_v62  ;;  %v225_v61 = vld [vmem:[#allocation2 + $0x590] sm:$0xff]  ;;  %v200_v62 = vld [vmem:[#allocation2 + $0x4c8] sm:$0xff] }
  0x88   :  { %732 = vmatprep.subr.mxu0 %v148_v63  ;;  %802 = vmatprep.subr.mxu1 %v150_v0  ;;  %v202_v63 = vld [vmem:[#allocation2 + $0x4d8] sm:$0xff]  ;;  %v199_v0 = vld [vmem:[#allocation2 + $0x4c0] sm:$0xff] }
  0x8b   :  { %733 = vmatpush1.xpose.msra.mxu0 %v147_v1  ;;  %803 = vmatpush1.xpose.msra.mxu1 %v149_v2  ;;  %v201_v1 = vld [vmem:[#allocation2 + $0x4d0] sm:$0xff]  ;;  %v176_v2 = vld [vmem:[#allocation2 + $0x408] sm:$0xff] }
  0x8c   :  { %734 = vmatprep.subr.mxu0 %v124_v3  ;;  %804 = vmatprep.subr.mxu1 %v126_v4  ;;  %v178_v3 = vld [vmem:[#allocation2 + $0x418] sm:$0xff]  ;;  %v175_v4 = vld [vmem:[#allocation2 + $0x400] sm:$0xff] }
  0x8f   :  { %735 = vmatpush1.xpose.msra.mxu0 %v123_v5  ;;  %805 = vmatpush1.xpose.msra.mxu1 %v125_v6  ;;  %v177_v5 = vld [vmem:[#allocation2 + $0x410] sm:$0xff]  ;;  %v152_v6 = vld [vmem:[#allocation2 + $0x348] sm:$0xff] }
  0x90   :  { %736 = vmatprep.subr.mxu0 %v100_v7  ;;  %806 = vmatprep.subr.mxu1 %v102_v8  ;;  %v154_v7 = vld [vmem:[#allocation2 + $0x358] sm:$0xff]  ;;  %v151_v8 = vld [vmem:[#allocation2 + $0x340] sm:$0xff] }
  0x93   :  { %737 = vmatpush1.xpose.msra.mxu0 %v99_v9  ;;  %807 = vmatpush1.xpose.msra.mxu1 %v101_v10  ;;  %v153_v9 = vld [vmem:[#allocation2 + $0x350] sm:$0xff]  ;;  %v128_v10 = vld [vmem:[#allocation2 + $0x288] sm:$0xff] }
  0x94   :  { %738 = vmatprep.subr.mxu0 %v76_v11  ;;  %808 = vmatprep.subr.mxu1 %v78_v12  ;;  %v130_v11 = vld [vmem:[#allocation2 + $0x298] sm:$0xff]  ;;  %v127_v12 = vld [vmem:[#allocation2 + $0x280] sm:$0xff] }
  0x97   :  { %739 = vmatpush1.xpose.msra.mxu0 %v75_v14  ;;  %809 = vmatpush1.xpose.msra.mxu1 %v77_v15  ;;  %v104_v14 = vld [vmem:[#allocation2 + $0x1c8] sm:$0xff]  ;;  %v106_v15 = vld [vmem:[#allocation2 + $0x1d8] sm:$0xff] }
  0x98   :  { %740 = vmatprep.subr.mxu0 %v52_v18  ;;  %810 = vmatprep.subr.mxu1 %v54_v19  ;;  %v103_v18 = vld [vmem:[#allocation2 + $0x1c0] sm:$0xff]  ;;  %v105_v19 = vld [vmem:[#allocation2 + $0x1d0] sm:$0xff] }
  0x9b   :  { %741 = vmatpush1.xpose.msra.mxu0 %v51_v21  ;;  %811 = vmatpush1.xpose.msra.mxu1 %v53_v22  ;;  %v82_v21 = vld [vmem:[#allocation2 + $0x118] sm:$0xff] }
  0x9c   :  { %850 = vmatprep.subr.mxu0 %v416_v23  ;;  %920 = vmatprep.subr.mxu1 %v418_v24  ;;  %v44_v22 = vld [vmem:[%s1639_s0 + $0x18] sm:$0xff]  ;;  %v79_v23 = vld [vmem:[#allocation2 + $0x100] sm:$0xff]  ;;  %v81_v24 = vld [vmem:[#allocation2 + $0x110] sm:$0xff] }
  0x9e   :  { %775 = vmatmul.mubr.f32.vlgmr.msra.gmra.mxu0 %v1557_v16  ;;  %845 = vmatmul.mubr.f32.vlgmr.msra.gmra.mxu1 %v1560_v17  ;;  %v346_v16 = vld [vmem:[#allocation2 + $0x958] sm:$0xff]  ;;  %v343_v17 = vld [vmem:[#allocation2 + $0x940] sm:$0xff] }
  0x9f   :  { %851 = vmatpush1.xpose.msra.mxu0 %v415_v28  ;;  %921 = vmatpush1.xpose.msra.mxu1 %v417_v29  ;;  %v56_v28 = vld [vmem:[#allocation2 + $0x48] sm:$0xff]  ;;  %v58_v29 = vld [vmem:[#allocation2 + $0x58] sm:$0xff] }
  0xa0   :  { %852 = vmatprep.subr.mxu0 %v392_v30  ;;  %922 = vmatprep.subr.mxu1 %v394_v31  ;;  %v495_v30 = vcombine.high %v44_v22, %v44_v22  ;;  %v55_v31 = vld [vmem:[#allocation2 + $0x40] sm:$0xff] }
  0xa1   :  { %914 = vmatprep.mubr.f32.mxu0 %v493_v32  ;;  %984 = vmatprep.mubr.f32.mxu1 %v494_v33  ;;  %v57_v32 = vld [vmem:[#allocation2 + $0x50] sm:$0xff]  ;;  %v420_v33 = vld [vmem:[#allocation2 + $0xba8] sm:$0xff] }
  0xa3   :  { %853 = vmatpush1.xpose.msra.mxu0 %v391_v34  ;;  %923 = vmatpush1.xpose.msra.mxu1 %v393_v35  ;;  %v422_v34 = vld [vmem:[#allocation2 + $0xbb8] sm:$0xff]  ;;  %v1587_v35 = vrot.slane %v44_v22, %v1538_v27  ;;  %v133_v22 = vld [vmem:[#allocation2 + $0x2b0] sm:$0xff] }
  0xa4   :  { %854 = vmatprep.subr.mxu0 %v368_v36  ;;  %924 = vmatprep.subr.mxu1 %v370_v37  ;;  %v1590_v36 = vrot.slane %v495_v30, %v1538_v27  ;;  %v419_v37 = vld [vmem:[#allocation2 + $0xba0] sm:$0xff]  ;;  %v84_v30 = vld [vmem:[#allocation2 + $0x128] sm:$0xff] }
  0xa7   :  { %855 = vmatpush1.xpose.msra.mxu0 %v367_v38  ;;  %925 = vmatpush1.xpose.msra.mxu1 %v369_v39  ;;  %v421_v38 = vld [vmem:[#allocation2 + $0xbb0] sm:$0xff]  ;;  %v396_v39 = vld [vmem:[#allocation2 + $0xae8] sm:$0xff] }
  0xa8   :  { %856 = vmatprep.subr.mxu0 %v344_v40  ;;  %926 = vmatprep.subr.mxu1 %v346_v16  ;;  %v398_v40 = vld [vmem:[#allocation2 + $0xaf8] sm:$0xff]  ;;  %v510_v16 = vcombine.high %v1587_v35, %v1587_v35 }
  0xab   :  { %857 = vmatpush1.xpose.msra.mxu0 %v343_v17  ;;  %927 = vmatpush1.xpose.msra.mxu1 %v345_v41  ;;  %v511_v17 = vcombine.high %v1590_v36, %v1590_v36  ;;  %v395_v41 = vld [vmem:[#allocation2 + $0xae0] sm:$0xff] }
  0xac   :  { %858 = vmatprep.subr.mxu0 %v320_v42  ;;  %928 = vmatprep.subr.mxu1 %v322_v43  ;;  %v397_v42 = vld [vmem:[#allocation2 + $0xaf0] sm:$0xff]  ;;  %v372_v43 = vld [vmem:[#allocation2 + $0xa28] sm:$0xff] }
  0xaf   :  { %859 = vmatpush1.xpose.msra.mxu0 %v319_v44  ;;  %929 = vmatpush1.xpose.msra.mxu1 %v321_v45  ;;  %v374_v44 = vld [vmem:[#allocation2 + $0xa38] sm:$0xff]  ;;  %v371_v45 = vld [vmem:[#allocation2 + $0xa20] sm:$0xff] }
  0xb0   :  { %860 = vmatprep.subr.mxu0 %v296_v46  ;;  %930 = vmatprep.subr.mxu1 %v298_v47  ;;  %v373_v46 = vld [vmem:[#allocation2 + $0xa30] sm:$0xff]  ;;  %v348_v47 = vld [vmem:[#allocation2 + $0x968] sm:$0xff] }
  0xb3   :  { %861 = vmatpush1.xpose.msra.mxu0 %v295_v48  ;;  %931 = vmatpush1.xpose.msra.mxu1 %v297_v49  ;;  %v349_v48 = vld [vmem:[#allocation2 + $0x970] sm:$0xff]  ;;  %v324_v49 = vld [vmem:[#allocation2 + $0x8a8] sm:$0xff] }
  0xb4   :  { %862 = vmatprep.subr.mxu0 %v272_v50  ;;  %932 = vmatprep.subr.mxu1 %v274_v51  ;;  %v326_v50 = vld [vmem:[#allocation2 + $0x8b8] sm:$0xff]  ;;  %v323_v51 = vld [vmem:[#allocation2 + $0x8a0] sm:$0xff] }
  0xb7   :  { %863 = vmatpush1.xpose.msra.mxu0 %v271_v52  ;;  %933 = vmatpush1.xpose.msra.mxu1 %v273_v53  ;;  %v325_v52 = vld [vmem:[#allocation2 + $0x8b0] sm:$0xff]  ;;  %v300_v53 = vld [vmem:[#allocation2 + $0x7e8] sm:$0xff] }
  0xb8   :  { %864 = vmatprep.subr.mxu0 %v248_v54  ;;  %934 = vmatprep.subr.mxu1 %v250_v55  ;;  %v302_v54 = vld [vmem:[#allocation2 + $0x7f8] sm:$0xff]  ;;  %v299_v55 = vld [vmem:[#allocation2 + $0x7e0] sm:$0xff] }
  0xbb   :  { %865 = vmatpush1.xpose.msra.mxu0 %v247_v56  ;;  %935 = vmatpush1.xpose.msra.mxu1 %v249_v57  ;;  %v301_v56 = vld [vmem:[#allocation2 + $0x7f0] sm:$0xff]  ;;  %v276_v57 = vld [vmem:[#allocation2 + $0x728] sm:$0xff] }
  0xbc   :  { %866 = vmatprep.subr.mxu0 %v224_v58  ;;  %936 = vmatprep.subr.mxu1 %v226_v59  ;;  %v278_v58 = vld [vmem:[#allocation2 + $0x738] sm:$0xff]  ;;  %v275_v59 = vld [vmem:[#allocation2 + $0x720] sm:$0xff] }
  0xbf   :  { %867 = vmatpush1.xpose.msra.mxu0 %v223_v60  ;;  %937 = vmatpush1.xpose.msra.mxu1 %v225_v61  ;;  %v277_v60 = vld [vmem:[#allocation2 + $0x730] sm:$0xff]  ;;  %v252_v61 = vld [vmem:[#allocation2 + $0x668] sm:$0xff] }
  0xc0   :  { %868 = vmatprep.subr.mxu0 %v200_v62  ;;  %938 = vmatprep.subr.mxu1 %v202_v63  ;;  %v254_v62 = vld [vmem:[#allocation2 + $0x678] sm:$0xff]  ;;  %v251_v63 = vld [vmem:[#allocation2 + $0x660] sm:$0xff] }
  0xc3   :  { %869 = vmatpush1.xpose.msra.mxu0 %v199_v0  ;;  %939 = vmatpush1.xpose.msra.mxu1 %v201_v1  ;;  %v253_v0 = vld [vmem:[#allocation2 + $0x670] sm:$0xff]  ;;  %v228_v1 = vld [vmem:[#allocation2 + $0x5a8] sm:$0xff] }
  0xc4   :  { %870 = vmatprep.subr.mxu0 %v176_v2  ;;  %940 = vmatprep.subr.mxu1 %v178_v3  ;;  %v230_v2 = vld [vmem:[#allocation2 + $0x5b8] sm:$0xff]  ;;  %v227_v3 = vld [vmem:[#allocation2 + $0x5a0] sm:$0xff] }
  0xc7   :  { %871 = vmatpush1.xpose.msra.mxu0 %v175_v4  ;;  %941 = vmatpush1.xpose.msra.mxu1 %v177_v5  ;;  %v229_v4 = vld [vmem:[#allocation2 + $0x5b0] sm:$0xff]  ;;  %v204_v5 = vld [vmem:[#allocation2 + $0x4e8] sm:$0xff] }
  0xc8   :  { %872 = vmatprep.subr.mxu0 %v152_v6  ;;  %942 = vmatprep.subr.mxu1 %v154_v7  ;;  %v206_v6 = vld [vmem:[#allocation2 + $0x4f8] sm:$0xff]  ;;  %v203_v7 = vld [vmem:[#allocation2 + $0x4e0] sm:$0xff] }
  0xcb   :  { %873 = vmatpush1.xpose.msra.mxu0 %v151_v8  ;;  %943 = vmatpush1.xpose.msra.mxu1 %v153_v9  ;;  %v205_v8 = vld [vmem:[#allocation2 + $0x4f0] sm:$0xff]  ;;  %v180_v9 = vld [vmem:[#allocation2 + $0x428] sm:$0xff] }
  0xcc   :  { %874 = vmatprep.subr.mxu0 %v128_v10  ;;  %944 = vmatprep.subr.mxu1 %v130_v11  ;;  %v182_v10 = vld [vmem:[#allocation2 + $0x438] sm:$0xff]  ;;  %v179_v11 = vld [vmem:[#allocation2 + $0x420] sm:$0xff] }
  0xcf   :  { %875 = vmatpush1.xpose.msra.mxu0 %v127_v12  ;;  %945 = vmatpush1.xpose.msra.mxu1 %v129_v13  ;;  %v181_v12 = vld [vmem:[#allocation2 + $0x430] sm:$0xff]  ;;  %v156_v13 = vld [vmem:[#allocation2 + $0x368] sm:$0xff] }
  0xd0   :  { %876 = vmatprep.subr.mxu0 %v104_v14  ;;  %946 = vmatprep.subr.mxu1 %v106_v15  ;;  %v158_v14 = vld [vmem:[#allocation2 + $0x378] sm:$0xff]  ;;  %v155_v15 = vld [vmem:[#allocation2 + $0x360] sm:$0xff] }
  0xd3   :  { %877 = vmatpush1.xpose.msra.mxu0 %v103_v18  ;;  %947 = vmatpush1.xpose.msra.mxu1 %v105_v19  ;;  %v157_v18 = vld [vmem:[#allocation2 + $0x370] sm:$0xff]  ;;  %v132_v19 = vld [vmem:[#allocation2 + $0x2a8] sm:$0xff] }
  0xd4   :  { %878 = vmatprep.subr.mxu0 %v80_v20  ;;  %948 = vmatprep.subr.mxu1 %v82_v21  ;;  %v134_v20 = vld [vmem:[#allocation2 + $0x2b8] sm:$0xff]  ;;  %v131_v21 = vld [vmem:[#allocation2 + $0x2a0] sm:$0xff] }
  0xd7   :  { %879 = vmatpush1.xpose.msra.mxu0 %v79_v23  ;;  %949 = vmatpush1.xpose.msra.mxu1 %v81_v24  ;;  %v108_v23 = vld [vmem:[#allocation2 + $0x1e8] sm:$0xff]  ;;  %v110_v24 = vld [vmem:[#allocation2 + $0x1f8] sm:$0xff] }
  0xd8   :  { %880 = vmatprep.subr.mxu0 %v56_v28  ;;  %950 = vmatprep.subr.mxu1 %v58_v29  ;;  %v107_v28 = vld [vmem:[#allocation2 + $0x1e0] sm:$0xff]  ;;  %v109_v29 = vld [vmem:[#allocation2 + $0x1f0] sm:$0xff] }
  0xdb   :  { %881 = vmatpush1.xpose.msra.mxu0 %v55_v31  ;;  %951 = vmatpush1.xpose.msra.mxu1 %v57_v32  ;;  %v86_v31 = vld [vmem:[#allocation2 + $0x138] sm:$0xff]  ;;  %v45_v32 = vld [vmem:[%s1639_s0 + $0x20] sm:$0xff] }
  0xdc   :  { %990 = vmatprep.subr.mxu0 %v420_v33  ;;  %1060 = vmatprep.subr.mxu1 %v422_v34  ;;  %v83_v33 = vld [vmem:[#allocation2 + $0x120] sm:$0xff]  ;;  %v85_v34 = vld [vmem:[#allocation2 + $0x130] sm:$0xff] }
  0xde   :  { %915 = vmatmul.mubr.f32.vlgmr.msra.gmra.mxu0 %v1572_v25  ;;  %985 = vmatmul.mubr.f32.vlgmr.msra.gmra.mxu1 %v1575_v26  ;;  %v350_v25 = vld [vmem:[#allocation2 + $0x978] sm:$0xff]  ;;  %v347_v26 = vld [vmem:[#allocation2 + $0x960] sm:$0xff] }
  0xdf   :  { %991 = vmatpush1.xpose.msra.mxu0 %v419_v37  ;;  %1061 = vmatpush1.xpose.msra.mxu1 %v421_v38  ;;  %v60_v37 = vld [vmem:[#allocation2 + $0x68] sm:$0xff]  ;;  %v62_v38 = vld [vmem:[#allocation2 + $0x78] sm:$0xff] }
  0xe0   :  { %992 = vmatprep.subr.mxu0 %v396_v39  ;;  %1062 = vmatprep.subr.mxu1 %v398_v40  ;;  %v512_v39 = vcombine.high %v45_v32, %v45_v32  ;;  %v59_v40 = vld [vmem:[#allocation2 + $0x60] sm:$0xff] }
  0xe1   :  { %1054 = vmatprep.mubr.f32.mxu0 %v510_v16  ;;  %1124 = vmatprep.mubr.f32.mxu1 %v511_v17  ;;  %v61_v16 = vld [vmem:[#allocation2 + $0x70] sm:$0xff]  ;;  %v424_v17 = vld [vmem:[#allocation2 + $0xbc8] sm:$0xff] }
  0xe3   :  { %993 = vmatpush1.xpose.msra.mxu0 %v395_v41  ;;  %1063 = vmatpush1.xpose.msra.mxu1 %v397_v42  ;;  %v426_v41 = vld [vmem:[#allocation2 + $0xbd8] sm:$0xff]  ;;  %v1602_v42 = vrot.slane %v45_v32, %v1538_v27  ;;  %v160_v32 = vld [vmem:[#allocation2 + $0x388] sm:$0xff] }
  0xe4   :  { %994 = vmatprep.subr.mxu0 %v372_v43  ;;  %1064 = vmatprep.subr.mxu1 %v374_v44  ;;  %v1605_v43 = vrot.slane %v512_v39, %v1538_v27  ;;  %v1427_v44 = vld [vmem:[#allocation5] ss:$0 sm:$0xff]  ;;  %v138_v39 = vld [vmem:[#allocation2 + $0x2d8] sm:$0xff] }
  0xe7   :  { %995 = vmatpush1.xpose.msra.mxu0 %v371_v45  ;;  %1065 = vmatpush1.xpose.msra.mxu1 %v373_v46  ;;  %v423_v45 = vld [vmem:[#allocation2 + $0xbc0] sm:$0xff]  ;;  %v425_v46 = vld [vmem:[#allocation2 + $0xbd0] sm:$0xff] }
  0xe8   :  { %996 = vmatprep.subr.mxu0 %v348_v47  ;;  %1066 = vmatprep.subr.mxu1 %v350_v25  ;;  %v400_v47 = vld [vmem:[#allocation2 + $0xb08] sm:$0xff]  ;;  %v402_v25 = vld [vmem:[#allocation2 + $0xb18] sm:$0xff] }
  0xeb   :  { %997 = vmatpush1.xpose.msra.mxu0 %v347_v26  ;;  %1067 = vmatpush1.xpose.msra.mxu1 %v349_v48  ;;  %v527_v26 = vcombine.high %v1602_v42, %v1602_v42  ;;  %v528_v48 = vcombine.high %v1605_v43, %v1605_v43 }
  0xec   :  { %998 = vmatprep.subr.mxu0 %v324_v49  ;;  %1068 = vmatprep.subr.mxu1 %v326_v50 }
  0xef   :  { %999 = vmatpush1.xpose.msra.mxu0 %v323_v51  ;;  %1069 = vmatpush1.xpose.msra.mxu1 %v325_v52 }
  0xf0   :  { %1000 = vmatprep.subr.mxu0 %v300_v53  ;;  %1070 = vmatprep.subr.mxu1 %v302_v54  ;;  %v399_v54 = vld [vmem:[#allocation2 + $0xb00] sm:$0xff] }
  0xf3   :  { %1001 = vmatpush1.xpose.msra.mxu0 %v299_v55  ;;  %1071 = vmatpush1.xpose.msra.mxu1 %v301_v56  ;;  %v401_v55 = vld [vmem:[#allocation2 + $0xb10] sm:$0xff] }
  0xf4   :  { %1002 = vmatprep.subr.mxu0 %v276_v57  ;;  %1072 = vmatprep.subr.mxu1 %v278_v58  ;;  %v376_v57 = vld [vmem:[#allocation2 + $0xa48] sm:$0xff]  ;;  %v378_v58 = vld [vmem:[#allocation2 + $0xa58] sm:$0xff] }
  0xf7   :  { %1003 = vmatpush1.xpose.msra.mxu0 %v275_v59  ;;  %1073 = vmatpush1.xpose.msra.mxu1 %v277_v60  ;;  %v352_v59 = vld [vmem:[#allocation2 + $0x988] sm:$0xff]  ;;  %v354_v60 = vld [vmem:[#allocation2 + $0x998] sm:$0xff] }
  0xf8   :  { %1004 = vmatprep.subr.mxu0 %v252_v61  ;;  %1074 = vmatprep.subr.mxu1 %v254_v62  ;;  %v351_v61 = vld [vmem:[#allocation2 + $0x980] sm:$0xff]  ;;  %v353_v62 = vld [vmem:[#allocation2 + $0x990] sm:$0xff] }
  0xfb   :  { %1005 = vmatpush1.xpose.msra.mxu0 %v251_v63  ;;  %1075 = vmatpush1.xpose.msra.mxu1 %v253_v0  ;;  %v328_v63 = vld [vmem:[#allocation2 + $0x8c8] sm:$0xff]  ;;  %v330_v0 = vld [vmem:[#allocation2 + $0x8d8] sm:$0xff] }
  0xfc   :  { %1006 = vmatprep.subr.mxu0 %v228_v1  ;;  %1076 = vmatprep.subr.mxu1 %v230_v2  ;;  %v327_v1 = vld [vmem:[#allocation2 + $0x8c0] sm:$0xff]  ;;  %v329_v2 = vld [vmem:[#allocation2 + $0x8d0] sm:$0xff] }
  0xff   :  { %1007 = vmatpush1.xpose.msra.mxu0 %v227_v3  ;;  %1077 = vmatpush1.xpose.msra.mxu1 %v229_v4  ;;  %v304_v3 = vld [vmem:[#allocation2 + $0x808] sm:$0xff]  ;;  %v306_v4 = vld [vmem:[#allocation2 + $0x818] sm:$0xff] }
 0x100   :  { %1008 = vmatprep.subr.mxu0 %v204_v5  ;;  %1078 = vmatprep.subr.mxu1 %v206_v6  ;;  %v303_v5 = vld [vmem:[#allocation2 + $0x800] sm:$0xff]  ;;  %v305_v6 = vld [vmem:[#allocation2 + $0x810] sm:$0xff] }
 0x103   :  { %1009 = vmatpush1.xpose.msra.mxu0 %v203_v7  ;;  %1079 = vmatpush1.xpose.msra.mxu1 %v205_v8  ;;  %v280_v7 = vld [vmem:[#allocation2 + $0x748] sm:$0xff]  ;;  %v282_v8 = vld [vmem:[#allocation2 + $0x758] sm:$0xff] }
 0x104   :  { %1010 = vmatprep.subr.mxu0 %v180_v9  ;;  %1080 = vmatprep.subr.mxu1 %v182_v10  ;;  %v279_v9 = vld [vmem:[#allocation2 + $0x740] sm:$0xff]  ;;  %v281_v10 = vld [vmem:[#allocation2 + $0x750] sm:$0xff] }
 0x107   :  { %1011 = vmatpush1.xpose.msra.mxu0 %v179_v11  ;;  %1081 = vmatpush1.xpose.msra.mxu1 %v181_v12  ;;  %v256_v11 = vld [vmem:[#allocation2 + $0x688] sm:$0xff]  ;;  %v258_v12 = vld [vmem:[#allocation2 + $0x698] sm:$0xff] }
 0x108   :  { %1012 = vmatprep.subr.mxu0 %v156_v13  ;;  %1082 = vmatprep.subr.mxu1 %v158_v14  ;;  %v255_v13 = vld [vmem:[#allocation2 + $0x680] sm:$0xff]  ;;  %v257_v14 = vld [vmem:[#allocation2 + $0x690] sm:$0xff] }
 0x10b   :  { %1013 = vmatpush1.xpose.msra.mxu0 %v155_v15  ;;  %1083 = vmatpush1.xpose.msra.mxu1 %v157_v18  ;;  %v232_v15 = vld [vmem:[#allocation2 + $0x5c8] sm:$0xff]  ;;  %v234_v18 = vld [vmem:[#allocation2 + $0x5d8] sm:$0xff] }
 0x10c   :  { %1014 = vmatprep.subr.mxu0 %v132_v19  ;;  %1084 = vmatprep.subr.mxu1 %v134_v20  ;;  %v231_v19 = vld [vmem:[#allocation2 + $0x5c0] sm:$0xff]  ;;  %v233_v20 = vld [vmem:[#allocation2 + $0x5d0] sm:$0xff] }
 0x10f   :  { %1015 = vmatpush1.xpose.msra.mxu0 %v131_v21  ;;  %1085 = vmatpush1.xpose.msra.mxu1 %v133_v22  ;;  %v208_v21 = vld [vmem:[#allocation2 + $0x508] sm:$0xff]  ;;  %v210_v22 = vld [vmem:[#allocation2 + $0x518] sm:$0xff] }
 0x110   :  { %1016 = vmatprep.subr.mxu0 %v108_v23  ;;  %1086 = vmatprep.subr.mxu1 %v110_v24  ;;  %v207_v23 = vld [vmem:[#allocation2 + $0x500] sm:$0xff]  ;;  %v209_v24 = vld [vmem:[#allocation2 + $0x510] sm:$0xff] }
 0x113   :  { %1017 = vmatpush1.xpose.msra.mxu0 %v107_v28  ;;  %1087 = vmatpush1.xpose.msra.mxu1 %v109_v29  ;;  %v184_v28 = vld [vmem:[#allocation2 + $0x448] sm:$0xff]  ;;  %v186_v29 = vld [vmem:[#allocation2 + $0x458] sm:$0xff] }
 0x114   :  { %1018 = vmatprep.subr.mxu0 %v84_v30  ;;  %1088 = vmatprep.subr.mxu1 %v86_v31  ;;  %v183_v30 = vld [vmem:[#allocation2 + $0x440] sm:$0xff]  ;;  %v185_v31 = vld [vmem:[#allocation2 + $0x450] sm:$0xff] }
 0x117   :  { %1019 = vmatpush1.xpose.msra.mxu0 %v83_v33  ;;  %1089 = vmatpush1.xpose.msra.mxu1 %v85_v34  ;;  %v162_v33 = vld [vmem:[#allocation2 + $0x398] sm:$0xff]  ;;  %v159_v34 = vld [vmem:[#allocation2 + $0x380] sm:$0xff] }
 0x118   :  { %1020 = vmatprep.subr.mxu0 %v60_v37  ;;  %1090 = vmatprep.subr.mxu1 %v62_v38  ;;  %v161_v37 = vld [vmem:[#allocation2 + $0x390] sm:$0xff]  ;;  %v136_v38 = vld [vmem:[#allocation2 + $0x2c8] sm:$0xff] }
 0x11b   :  { %1021 = vmatpush1.xpose.msra.mxu0 %v59_v40  ;;  %1091 = vmatpush1.xpose.msra.mxu1 %v61_v16  ;;  %v135_v40 = vld [vmem:[#allocation2 + $0x2c0] sm:$0xff]  ;;  %v137_v16 = vld [vmem:[#allocation2 + $0x2d0] sm:$0xff] }
 0x11c   :  { %1130 = vmatprep.subr.mxu0 %v424_v17  ;;  %1200 = vmatprep.subr.mxu1 %v426_v41  ;;  %v112_v17 = vld [vmem:[#allocation2 + $0x208] sm:$0xff]  ;;  %v114_v41 = vld [vmem:[#allocation2 + $0x218] sm:$0xff] }
 0x11e   :  { %v636_v49 = vpop.f32.mrf.mxu0  ;;  %1055 = vmatmul.mubr.f32.vlgmr.msra.gmra.mxu0 %v1587_v35  ;;  %v706_v50 = vpop.f32.mrf.mxu1  ;;  %1125 = vmatmul.mubr.f32.vlgmr.msra.gmra.mxu1 %v1590_v36  ;;  %v375_v35 = vld [vmem:[#allocation2 + $0xa40] sm:$0xff]  ;;  %v377_v36 = vld [vmem:[#allocation2 + $0xa50] sm:$0xff] }
 0x11f   :  { %v637_v51 = vadd.f32 %v1427_v44, %v636_v49  ;;  %1131 = vmatpush1.xpose.msra.mxu0 %v423_v45  ;;  %1201 = vmatpush1.xpose.msra.mxu1 %v425_v46  ;;  %v111_v44 = vld [vmem:[#allocation2 + $0x200] sm:$0xff]  ;;  %v113_v45 = vld [vmem:[#allocation2 + $0x210] sm:$0xff]  ;;  %v88_v46 = vld [vmem:[#allocation2 + $0x148] sm:$0xff] }
 0x120   :  { %v638_v52 = vpop.f32.mrf.mxu0  ;;  %v708_v53 = vpop.f32.mrf.mxu1  ;;  %1132 = vmatprep.subr.mxu0 %v400_v47  ;;  %1202 = vmatprep.subr.mxu1 %v402_v25  ;;  %v90_v47 = vld [vmem:[#allocation2 + $0x158] sm:$0xff]  ;;  %v46_v25 = vld [vmem:[%s1639_s0 + $0x28] sm:$0xff]  ;;  %s1511_s0 = smov [#allocation7]  }
 0x121   :  { %v1613_v56 = vadd.f32 %v706_v50, %v637_v51  ;;  %1194 = vmatprep.mubr.f32.mxu0 %v527_v26  ;;  %1264 = vmatprep.mubr.f32.mxu1 %v528_v48  ;;  %v87_v26 = vld [vmem:[#allocation2 + $0x140] sm:$0xff]  ;;  %v89_v48 = vld [vmem:[#allocation2 + $0x150] sm:$0xff]  ;;  %v64_v49 = vld [vmem:[#allocation2 + $0x88] sm:$0xff]  ;;  %v529_v51 = vcombine.high %v46_v25, %v46_v25  ;;  %s1417_s8 = sshll.u32 %s1511_s0, 4  ;;  %s1418_s8 = int_to_ptr.vmem [resolvable:$true] %s1417_s8 }
 0x122   :  { %v66_v50 = vld [vmem:[#allocation2 + $0x98] sm:$0xff]  ;;  %v63_v52 = vld [vmem:[#allocation2 + $0x80] sm:$0xff]  ;;  %v65_v53 = vld [vmem:[#allocation2 + $0x90] sm:$0xff]  ;;  %s1480_s9 = scalar_lea.vmem %s1418_s8, 32  ;;  %p1485_p11 = scmp.lt.s32.totalorder %s1418_s8, %s1418_s8 }
 0x123   :  { %1133 = vmatpush1.xpose.msra.mxu0 %v399_v54  ;;  %1203 = vmatpush1.xpose.msra.mxu1 %v401_v55  ;;  %v428_v54 = vld [vmem:[#allocation2 + $0xbe8] sm:$0xff]  ;;  %v430_v55 = vld [vmem:[#allocation2 + $0xbf8] sm:$0xff]  ;;  %p1481_p10 = scmp.ne.s32.totalorder %s1418_s8, %s1480_s9  ;;  %p1486_p12 = scmp.lt.s32.totalorder %s1480_s9, %s1480_s9 }
 0x124   :  { %1134 = vmatprep.subr.mxu0 %v376_v57  ;;  %1204 = vmatprep.subr.mxu1 %v378_v58  ;;  %v1619_v57 = vrot.slane %v46_v25, %v1538_v27  ;;  %v1622_v58 = vrot.slane %v529_v51, %v1538_v27  ;;  %v163_v25 = vld [vmem:[#allocation2 + $0x3a0] sm:$0xff]  ;;  %v141_v51 = vld [vmem:[#allocation2 + $0x2f0] sm:$0xff] }
 0x125   :  { %p1487_p13 = por %p1486_p12, %p1485_p11 }
 0x127   :  { %1135 = vmatpush1.xpose.msra.mxu0 %v375_v35  ;;  %1205 = vmatpush1.xpose.msra.mxu1 %v377_v36  ;;  %v427_v35 = vld [vmem:[#allocation2 + $0xbe0] sm:$0xff]  ;;  %v429_v36 = vld [vmem:[#allocation2 + $0xbf0] sm:$0xff]  ;;  %p1488_p0 = pnand %p1487_p13, %p1481_p10 }
 0x128   :  { %1136 = vmatprep.subr.mxu0 %v352_v59  ;;  %1206 = vmatprep.subr.mxu1 %v354_v60  ;;  %v404_v59 = vld [vmem:[#allocation2 + $0xb28] sm:$0xff]  ;;  %v406_v60 = vld [vmem:[#allocation2 + $0xb38] sm:$0xff] }
 0x12b   :  { %1137 = vmatpush1.xpose.msra.mxu0 %v351_v61  ;;  %1207 = vmatpush1.xpose.msra.mxu1 %v353_v62  ;;  %v544_v61 = vcombine.high %v1619_v57, %v1619_v57  ;;  %v545_v62 = vcombine.high %v1622_v58, %v1622_v58 }
 0x12c   :  { %1138 = vmatprep.subr.mxu0 %v328_v63  ;;  %1208 = vmatprep.subr.mxu1 %v330_v0 }
 0x12f   :  { %1139 = vmatpush1.xpose.msra.mxu0 %v327_v1  ;;  %1209 = vmatpush1.xpose.msra.mxu1 %v329_v2 }
 0x130   :  { %1140 = vmatprep.subr.mxu0 %v304_v3  ;;  %1210 = vmatprep.subr.mxu1 %v306_v4  ;;  %v403_v3 = vld [vmem:[#allocation2 + $0xb20] sm:$0xff]  ;;  %v405_v4 = vld [vmem:[#allocation2 + $0xb30] sm:$0xff] }
 0x133   :  { %1141 = vmatpush1.xpose.msra.mxu0 %v303_v5  ;;  %1211 = vmatpush1.xpose.msra.mxu1 %v305_v6  ;;  %v380_v6 = vld [vmem:[#allocation2 + $0xa68] sm:$0xff] }
 0x134   :  { %1142 = vmatprep.subr.mxu0 %v280_v7  ;;  %1212 = vmatprep.subr.mxu1 %v282_v8  ;;  %v382_v7 = vld [vmem:[#allocation2 + $0xa78] sm:$0xff] }
 0x135   :  { %v358_v8 = vld [vmem:[#allocation2 + $0x9b8] sm:$0xff] }
 0x137   :  { %1143 = vmatpush1.xpose.msra.mxu0 %v279_v9  ;;  %1213 = vmatpush1.xpose.msra.mxu1 %v281_v10  ;;  %v355_v9 = vld [vmem:[#allocation2 + $0x9a0] sm:$0xff]  ;;  %v357_v10 = vld [vmem:[#allocation2 + $0x9b0] sm:$0xff] }
 0x138   :  { %1144 = vmatprep.subr.mxu0 %v256_v11  ;;  %1214 = vmatprep.subr.mxu1 %v258_v12  ;;  %v332_v11 = vld [vmem:[#allocation2 + $0x8e8] sm:$0xff]  ;;  %v334_v12 = vld [vmem:[#allocation2 + $0x8f8] sm:$0xff] }
 0x13b   :  { %1145 = vmatpush1.xpose.msra.mxu0 %v255_v13  ;;  %1215 = vmatpush1.xpose.msra.mxu1 %v257_v14  ;;  %v331_v13 = vld [vmem:[#allocation2 + $0x8e0] sm:$0xff]  ;;  %v333_v14 = vld [vmem:[#allocation2 + $0x8f0] sm:$0xff] }
 0x13c   :  { %1146 = vmatprep.subr.mxu0 %v232_v15  ;;  %1216 = vmatprep.subr.mxu1 %v234_v18  ;;  %v308_v15 = vld [vmem:[#allocation2 + $0x828] sm:$0xff]  ;;  %v310_v18 = vld [vmem:[#allocation2 + $0x838] sm:$0xff] }
 0x13f   :  { %1147 = vmatpush1.xpose.msra.mxu0 %v231_v19  ;;  %1217 = vmatpush1.xpose.msra.mxu1 %v233_v20  ;;  %v307_v19 = vld [vmem:[#allocation2 + $0x820] sm:$0xff]  ;;  %v309_v20 = vld [vmem:[#allocation2 + $0x830] sm:$0xff] }
 0x140   :  { %1148 = vmatprep.subr.mxu0 %v208_v21  ;;  %1218 = vmatprep.subr.mxu1 %v210_v22  ;;  %v284_v21 = vld [vmem:[#allocation2 + $0x768] sm:$0xff]  ;;  %v286_v22 = vld [vmem:[#allocation2 + $0x778] sm:$0xff] }
 0x143   :  { %1149 = vmatpush1.xpose.msra.mxu0 %v207_v23  ;;  %1219 = vmatpush1.xpose.msra.mxu1 %v209_v24  ;;  %v283_v23 = vld [vmem:[#allocation2 + $0x760] sm:$0xff]  ;;  %v285_v24 = vld [vmem:[#allocation2 + $0x770] sm:$0xff] }
 0x144   :  { %1150 = vmatprep.subr.mxu0 %v184_v28  ;;  %1220 = vmatprep.subr.mxu1 %v186_v29  ;;  %v260_v28 = vld [vmem:[#allocation2 + $0x6a8] sm:$0xff]  ;;  %v262_v29 = vld [vmem:[#allocation2 + $0x6b8] sm:$0xff] }
 0x147   :  { %1151 = vmatpush1.xpose.msra.mxu0 %v183_v30  ;;  %1221 = vmatpush1.xpose.msra.mxu1 %v185_v31  ;;  %v259_v30 = vld [vmem:[#allocation2 + $0x6a0] sm:$0xff]  ;;  %v261_v31 = vld [vmem:[#allocation2 + $0x6b0] sm:$0xff] }
 0x148   :  { %1152 = vmatprep.subr.mxu0 %v160_v32  ;;  %1222 = vmatprep.subr.mxu1 %v162_v33  ;;  %v236_v32 = vld [vmem:[#allocation2 + $0x5e8] sm:$0xff]  ;;  %v238_v33 = vld [vmem:[#allocation2 + $0x5f8] sm:$0xff] }
 0x14b   :  { %1153 = vmatpush1.xpose.msra.mxu0 %v159_v34  ;;  %1223 = vmatpush1.xpose.msra.mxu1 %v161_v37  ;;  %v235_v34 = vld [vmem:[#allocation2 + $0x5e0] sm:$0xff]  ;;  %v237_v37 = vld [vmem:[#allocation2 + $0x5f0] sm:$0xff] }
 0x14c   :  { %1154 = vmatprep.subr.mxu0 %v136_v38  ;;  %1224 = vmatprep.subr.mxu1 %v138_v39  ;;  %v212_v38 = vld [vmem:[#allocation2 + $0x528] sm:$0xff]  ;;  %v214_v39 = vld [vmem:[#allocation2 + $0x538] sm:$0xff] }
 0x14f   :  { %1155 = vmatpush1.xpose.msra.mxu0 %v135_v40  ;;  %1225 = vmatpush1.xpose.msra.mxu1 %v137_v16  ;;  %v211_v40 = vld [vmem:[#allocation2 + $0x520] sm:$0xff]  ;;  %v213_v16 = vld [vmem:[#allocation2 + $0x530] sm:$0xff] }
 0x150   :  { %1156 = vmatprep.subr.mxu0 %v112_v17  ;;  %1226 = vmatprep.subr.mxu1 %v114_v41  ;;  %v188_v17 = vld [vmem:[#allocation2 + $0x468] sm:$0xff]  ;;  %v190_v41 = vld [vmem:[#allocation2 + $0x478] sm:$0xff] }
 0x153   :  { %1157 = vmatpush1.xpose.msra.mxu0 %v111_v44  ;;  %1227 = vmatpush1.xpose.msra.mxu1 %v113_v45  ;;  %v187_v44 = vld [vmem:[#allocation2 + $0x460] sm:$0xff]  ;;  %v189_v45 = vld [vmem:[#allocation2 + $0x470] sm:$0xff] }
 0x154   :  { %1158 = vmatprep.subr.mxu0 %v88_v46  ;;  %1228 = vmatprep.subr.mxu1 %v90_v47  ;;  %v164_v46 = vld [vmem:[#allocation2 + $0x3a8] sm:$0xff]  ;;  %v166_v47 = vld [vmem:[#allocation2 + $0x3b8] sm:$0xff] }
 0x157   :  { %1159 = vmatpush1.xpose.msra.mxu0 %v87_v26  ;;  %1229 = vmatpush1.xpose.msra.mxu1 %v89_v48  ;;  %v165_v26 = vld [vmem:[#allocation2 + $0x3b0] sm:$0xff]  ;;  %v140_v48 = vld [vmem:[#allocation2 + $0x2e8] sm:$0xff] }
 0x158   :  { %1160 = vmatprep.subr.mxu0 %v64_v49  ;;  %1230 = vmatprep.subr.mxu1 %v66_v50  ;;  %v142_v49 = vld [vmem:[#allocation2 + $0x2f8] sm:$0xff]  ;;  %v139_v50 = vld [vmem:[#allocation2 + $0x2e0] sm:$0xff] }
 0x15b   :  { %1161 = vmatpush1.xpose.msra.mxu0 %v63_v52  ;;  %1231 = vmatpush1.xpose.msra.mxu1 %v65_v53  ;;  %v116_v52 = vld [vmem:[#allocation2 + $0x228] sm:$0xff]  ;;  %v118_v53 = vld [vmem:[#allocation2 + $0x238] sm:$0xff] }
 0x15c   :  { %1270 = vmatprep.subr.mxu0 %v428_v54  ;;  %1340 = vmatprep.subr.mxu1 %v430_v55  ;;  %v115_v54 = vld [vmem:[#allocation2 + $0x220] sm:$0xff]  ;;  %v117_v55 = vld [vmem:[#allocation2 + $0x230] sm:$0xff] }
 0x15e   :  { %v776_v63 = vpop.f32.mrf.mxu0  ;;  %1195 = vmatmul.mubr.f32.vlgmr.msra.gmra.mxu0 %v1602_v42  ;;  %v846_v0 = vpop.f32.mrf.mxu1  ;;  %1265 = vmatmul.mubr.f32.vlgmr.msra.gmra.mxu1 %v1605_v43  ;;  %v379_v42 = vld [vmem:[#allocation2 + $0xa60] sm:$0xff]  ;;  %v381_v43 = vld [vmem:[#allocation2 + $0xa70] sm:$0xff] }
 0x15f   :  { %v777_v27 = vadd.f32 %v776_v63, %v1613_v56  ;;  %1271 = vmatpush1.xpose.msra.mxu0 %v427_v35  ;;  %1341 = vmatpush1.xpose.msra.mxu1 %v429_v36  ;;  %v356_v56 = vld [vmem:[#allocation2 + $0x9a8] sm:$0xff]  ;;  %v94_v36 = vld [vmem:[#allocation2 + $0x178] sm:$0xff]  ;;  %v67_v63 = vld [vmem:[#allocation2 + $0xa0] sm:$0xff] }
 0x160   :  { %v778_v1 = vpop.f32.mrf.mxu0  ;;  %v848_v2 = vpop.f32.mrf.mxu1  ;;  %1272 = vmatprep.subr.mxu0 %v404_v59  ;;  %1342 = vmatprep.subr.mxu1 %v406_v60  ;;  %v92_v35 = vld [vmem:[#allocation2 + $0x168] sm:$0xff]  ;;  %v91_v59 = vld [vmem:[#allocation2 + $0x160] sm:$0xff]  ;;  %v93_v60 = vld [vmem:[#allocation2 + $0x170] sm:$0xff] }
 0x161   :  { %v1631_v5 = vadd.f32 %v846_v0, %v777_v27  ;;  %1334 = vmatprep.mubr.f32.mxu0 %v544_v61  ;;  %1404 = vmatprep.mubr.f32.mxu1 %v545_v62  ;;  %v68_v61 = vld [vmem:[#allocation2 + $0xa8] sm:$0xff]  ;;  %v70_v62 = vld [vmem:[#allocation2 + $0xb8] sm:$0xff]  ;;  %v69_v0 = vld [vmem:[#allocation2 + $0xb0] sm:$0xff] }
 0x163   :  { %1273 = vmatpush1.xpose.msra.mxu0 %v403_v3  ;;  %1343 = vmatpush1.xpose.msra.mxu1 %v405_v4 }
 0x164   :  { %1274 = vmatprep.subr.mxu0 %v380_v6  ;;  %1344 = vmatprep.subr.mxu1 %v382_v7 }
 0x167   :  { %1275 = vmatpush1.xpose.msra.mxu0 %v379_v42  ;;  %1345 = vmatpush1.xpose.msra.mxu1 %v381_v43 }
 0x168   :  { %1276 = vmatprep.subr.mxu0 %v356_v56  ;;  %1346 = vmatprep.subr.mxu1 %v358_v8 }
 0x16b   :  { %1277 = vmatpush1.xpose.msra.mxu0 %v355_v9  ;;  %1347 = vmatpush1.xpose.msra.mxu1 %v357_v10 }
 0x16c   :  { %1278 = vmatprep.subr.mxu0 %v332_v11  ;;  %1348 = vmatprep.subr.mxu1 %v334_v12 }
 0x16f   :  { %1279 = vmatpush1.xpose.msra.mxu0 %v331_v13  ;;  %1349 = vmatpush1.xpose.msra.mxu1 %v333_v14 }
 0x170   :  { %1280 = vmatprep.subr.mxu0 %v308_v15  ;;  %1350 = vmatprep.subr.mxu1 %v310_v18 }
 0x173   :  { %1281 = vmatpush1.xpose.msra.mxu0 %v307_v19  ;;  %1351 = vmatpush1.xpose.msra.mxu1 %v309_v20 }
 0x174   :  { %1282 = vmatprep.subr.mxu0 %v284_v21  ;;  %1352 = vmatprep.subr.mxu1 %v286_v22 }
 0x177   :  { %1283 = vmatpush1.xpose.msra.mxu0 %v283_v23  ;;  %1353 = vmatpush1.xpose.msra.mxu1 %v285_v24 }
 0x178   :  { %1284 = vmatprep.subr.mxu0 %v260_v28  ;;  %1354 = vmatprep.subr.mxu1 %v262_v29 }
 0x17b   :  { %1285 = vmatpush1.xpose.msra.mxu0 %v259_v30  ;;  %1355 = vmatpush1.xpose.msra.mxu1 %v261_v31 }
 0x17c   :  { %1286 = vmatprep.subr.mxu0 %v236_v32  ;;  %1356 = vmatprep.subr.mxu1 %v238_v33 }
 0x17f   :  { %1287 = vmatpush1.xpose.msra.mxu0 %v235_v34  ;;  %1357 = vmatpush1.xpose.msra.mxu1 %v237_v37 }
 0x180   :  { %1288 = vmatprep.subr.mxu0 %v212_v38  ;;  %1358 = vmatprep.subr.mxu1 %v214_v39 }
 0x183   :  { %1289 = vmatpush1.xpose.msra.mxu0 %v211_v40  ;;  %1359 = vmatpush1.xpose.msra.mxu1 %v213_v16 }
 0x184   :  { %1290 = vmatprep.subr.mxu0 %v188_v17  ;;  %1360 = vmatprep.subr.mxu1 %v190_v41 }
 0x187   :  { %1291 = vmatpush1.xpose.msra.mxu0 %v187_v44  ;;  %1361 = vmatpush1.xpose.msra.mxu1 %v189_v45 }
 0x188   :  { %1292 = vmatprep.subr.mxu0 %v164_v46  ;;  %1362 = vmatprep.subr.mxu1 %v166_v47 }
 0x18b   :  { %1293 = vmatpush1.xpose.msra.mxu0 %v163_v25  ;;  %1363 = vmatpush1.xpose.msra.mxu1 %v165_v26 }
 0x18c   :  { %1294 = vmatprep.subr.mxu0 %v140_v48  ;;  %1364 = vmatprep.subr.mxu1 %v142_v49 }
 0x18f   :  { %1295 = vmatpush1.xpose.msra.mxu0 %v139_v50  ;;  %1365 = vmatpush1.xpose.msra.mxu1 %v141_v51 }
 0x190   :  { %1296 = vmatprep.subr.mxu0 %v116_v52  ;;  %1366 = vmatprep.subr.mxu1 %v118_v53 }
 0x193   :  { %1297 = vmatpush1.xpose.msra.mxu0 %v115_v54  ;;  %1367 = vmatpush1.xpose.msra.mxu1 %v117_v55 }
 0x194   :  { %1298 = vmatprep.subr.mxu0 %v92_v35  ;;  %1368 = vmatprep.subr.mxu1 %v94_v36 }
 0x197   :  { %1299 = vmatpush1.xpose.msra.mxu0 %v91_v59  ;;  %1369 = vmatpush1.xpose.msra.mxu1 %v93_v60 }
 0x198   :  { %1300 = vmatprep.subr.mxu0 %v68_v61  ;;  %1370 = vmatprep.subr.mxu1 %v70_v62 }
 0x19b   :  { %1301 = vmatpush1.xpose.msra.mxu0 %v67_v63  ;;  %1371 = vmatpush1.xpose.msra.mxu1 %v69_v0 }
 0x19e   :  { %v916_v27 = vpop.f32.mrf.mxu0  ;;  %1335 = vmatmul.mubr.f32.vlgmr.msra.gmra.mxu0 %v1619_v57  ;;  %1405 = vmatmul.mubr.f32.vlgmr.msra.gmra.mxu1 %v1622_v58  ;;  %v986_v1 = vpop.f32.mrf.mxu1 }
 0x19f   :  { %v917_v2 = vadd.f32 %v916_v27, %v1631_v5 }
 0x1a0   :  { %v918_v3 = vpop.f32.mrf.mxu0  ;;  %v988_v4 = vpop.f32.mrf.mxu1 }
 0x1a1   :  { %v987_v6 = vadd.f32 %v986_v1, %v917_v2 }
 0x1de   :  { %v1056_v7 = vpop.f32.mrf.mxu0  ;;  %v1126_v42 = vpop.f32.mrf.mxu1 }
 0x1df   :  { %v1057_v43 = vadd.f32 %v1056_v7, %v987_v6 }
 0x1e0   :  { %v1058_v56 = vpop.f32.mrf.mxu0  ;;  %v1128_v8 = vpop.f32.mrf.mxu1 }
 0x1e1   :  { %v1127_v9 = vadd.f32 %v1126_v42, %v1057_v43 }
 0x21e   :  { %v1196_v10 = vpop.f32.mrf.mxu0  ;;  %v1266_v11 = vpop.f32.mrf.mxu1 }
 0x21f   :  { %v1197_v14 = vadd.f32 %v1196_v10, %v1127_v9 }
 0x220   :  { %v1198_v12 = vpop.f32.mrf.mxu0  ;;  %v1268_v13 = vpop.f32.mrf.mxu1 }
 0x221   :  { %v1267_v57 = vadd.f32 %v1266_v11, %v1197_v14 }
 0x25e   :  { %v1336_v15 = vpop.f32.mrf.mxu0  ;;  %v1406_v58 = vpop.f32.mrf.mxu1 }
 0x25f   :  { %v1337_v5 = vadd.f32 %v1336_v15, %v1267_v57 }
 0x260   :  { %v1338_v18 = vpop.f32.mrf.mxu0  ;;  %v1408_v19 = vpop.f32.mrf.mxu1 }
 0x261   :  { %v1407_v20 = vadd.f32 %v1406_v58, %v1337_v5 }
 0x263   :  { %1410 = vst [vmem:[#allocation7] sm:$0x3] %v1407_v20 }
 0x264   :  { %1491 = shalt.err (!%p1488_p0)
}
 0x265   :  { %1420 = dma.vmem_to_hbm [thread:$0]  %s1418_s8, 32, %s1642_s3, [#allocation4]  }
 0x266   :  { %1504 = dma.done.wait [#allocation4], 32  }
 0x267   :  { %1505 = vsyncadd [#allocation4], 4294967264 }
 0x268   :  { %1424 = vsyncpa [#allocation3], 1 }
 0x269   :  { %1425 = vsyncpa [#allocation6], 1 }
 0x26a   :  { %1426 = vsyncpa [#allocation4], 1 }

</bundles_post_ra>
